<compile_context>
chip_gen: v6e
topology: v6e:2x2x1
jax: 0.10.0
libtpu: 0.0.40
codegen_flags: <defaults>
</compile_context>

<pallas_src>
import functools

import jax
import jax.numpy as jnp
from jax import lax
from jax.experimental import pallas as pl
from jax.experimental.pallas import tpu as pltpu

K = 3            # conv kernel size
CIN = 12
COUT = 12
KP = 128         # contraction dim (9*CIN = 108) zero-padded to one aligned MXU pass


def _conv_gemm_kernel(p_ref, w_ref, o_ref):
    # p_ref: (1, KP, H*W)   im2col patches for one image (K on sublanes, H*W on lanes)
    # w_ref: (COUT, KP)     reshaped + zero-padded weights
    # o_ref: (1, COUT, H*W) NCHW-flat output block (lane-dense: H*W on lanes)
    o_ref[0] = jnp.dot(
        w_ref[...], p_ref[0], preferred_element_type=jnp.float32
    ).astype(o_ref.dtype)


@jax.jit
def conv2d_3x3_pallas(x_nchw, w_oihw):
    """x_nchw: (N, CIN, H, W), w_oihw: (COUT, CIN, 3, 3) -> (N, COUT, H, W)."""
    N, C, H, W = x_nchw.shape
    assert C == CIN
    HW = H * W
    KK_CIN = K * K * CIN  # 108

    # --- im2col in the wrapper (single fused XLA producer, ~220 KB for these shapes) ---
    # patches[n, (kh*3+kw)*CIN + c, h*W + w] = x[n, c, h+kh-1, w+kw-1]  (zero padded)
    xp = jnp.pad(x_nchw, ((0, 0), (0, 0), (1, 1), (1, 1)))
    taps = [xp[:, :, kh:kh + H, kw:kw + W] for kh in range(K) for kw in range(K)]
    patches = jnp.stack(taps, axis=1).reshape(N, KK_CIN, HW)
    patches = jnp.pad(patches, ((0, 0), (0, KP - KK_CIN), (0, 0)))          # (N, 128, HW)

    # weights: OIHW -> (COUT, (kh*3+kw)*CIN + c), zero-padded K to 128
    w2 = jnp.transpose(w_oihw, (0, 2, 3, 1)).reshape(COUT, KK_CIN)
    w2 = jnp.pad(w2, ((0, 0), (0, KP - KK_CIN)))                            # (COUT, 128)

    out_flat = pl.pallas_call(
        _conv_gemm_kernel,
        out_shape=jax.ShapeDtypeStruct((N, COUT, HW), x_nchw.dtype),
        grid_spec=pltpu.PrefetchScalarGridSpec(
            num_scalar_prefetch=0,
            grid=(N,),
            in_specs=[
                pl.BlockSpec((1, KP, HW), lambda n: (n, 0, 0)),
                pl.BlockSpec((COUT, KP), lambda n: (0, 0)),
            ],
            out_specs=pl.BlockSpec((1, COUT, HW), lambda n: (n, 0, 0)),
        ),
        compiler_params=pltpu.CompilerParams(
            # parallel over batch: both TCs on v7x; ~0.35us/step overhead on v5e/v6e.
            dimension_semantics=("parallel",),
        ),
    )(patches, w2)

    # NCHW-flat -> NCHW is a contiguous (free) reshape; no transpose needed.
    return out_flat.reshape(N, COUT, H, W)


if __name__ == "__main__":
    key = jax.random.PRNGKey(0)
    kx, kw = jax.random.split(key)

    # Small shapes consistent with the module: batch=2, channels=12, spatial=16.
    N, H, W = 2, 16, 16
    x = jax.random.normal(kx, (N, CIN, H, W), dtype=jnp.float32)
    # Deterministic Conv2d-style weight init (fan_in scaled uniform).
    fan_in = CIN * K * K
    bound = 1.0 / (fan_in ** 0.5)
    w = jax.random.uniform(kw, (COUT, CIN, K, K), dtype=jnp.float32,
                           minval=-bound, maxval=bound)

    out = conv2d_3x3_pallas(x, w)
    out = jax.block_until_ready(out)

    # Reference check against lax conv (NCHW/OIHW, padding=1).
    ref = lax.conv_general_dilated(
        x, w, window_strides=(1, 1), padding=((1, 1), (1, 1)),
        dimension_numbers=("NCHW", "OIHW", "NCHW"))
    assert out.shape == (N, COUT, H, W)
    assert jnp.allclose(out, ref, atol=1e-4, rtol=1e-4)

    print("KERNEL_OK")
</pallas_src>

<mosaic_0001>
module attributes {stable_mosaic.version = 11 : i64} {
  func.func @_conv_gemm_kernel(%arg0: i32, %arg1: memref<1x128x256xf32, #tpu.memory_space<vmem>>, %arg2: memref<12x128xf32, #tpu.memory_space<vmem>>, %arg3: memref<1x12x256xf32, #tpu.memory_space<vmem>>) attributes {dimension_semantics = [#tpu.dimension_semantics<parallel>], iteration_bounds = array<i64: 2>, scalar_prefetch = 0 : i64, scratch_operands = 0 : i64, tpu.core_type = #tpu.core_type<tc>, window_params = [{transform_indices = @transform_0, window_bounds = array<i64: 1, 128, 256>}, {pipeline_mode = #tpu.pipeline_mode<synchronous>, transform_indices = @transform_1, window_bounds = array<i64: 12, 128>}, {transform_indices = @transform_2, window_bounds = array<i64: 1, 12, 256>}]} {
    %c0 = arith.constant 0 : index
    %c0_0 = arith.constant 0 : index
    %0 = vector.load %arg2[%c0, %c0_0] : memref<12x128xf32, #tpu.memory_space<vmem>>, vector<12x128xf32>
    %c0_1 = arith.constant 0 : index
    %c0_2 = arith.constant 0 : index
    %c0_3 = arith.constant 0 : index
    %1 = vector.load %arg1[%c0_1, %c0_2, %c0_3] : memref<1x128x256xf32, #tpu.memory_space<vmem>>, vector<1x128x256xf32>
    %2 = vector.shape_cast %1 : vector<1x128x256xf32> to vector<128x256xf32>
    %cst = arith.constant dense<0.000000e+00> : vector<12x256xf32>
    %3 = tpu.matmul %0, %2, %cst {dimension_numbers = #tpu.dot_dimension_numbers<[1], [0], [0], [1], [0, 0, 1, 1], [], []>} : vector<12x128xf32>, vector<128x256xf32>, vector<12x256xf32> -> vector<12x256xf32>
    %c0_4 = arith.constant 0 : index
    %c0_5 = arith.constant 0 : index
    %c0_6 = arith.constant 0 : index
    %4 = vector.load %arg3[%c0_4, %c0_5, %c0_6] : memref<1x12x256xf32, #tpu.memory_space<vmem>>, vector<1x12x256xf32>
    %5 = vector.shape_cast %4 : vector<1x12x256xf32> to vector<12x256xf32>
    %6 = vector.shape_cast %3 : vector<12x256xf32> to vector<1x12x256xf32>
    tpu.vector_store %arg3[%c0_4, %c0_5, %c0_6], %6 {strides = array<i32>} : memref<1x12x256xf32, #tpu.memory_space<vmem>>, vector<1x12x256xf32>,
    return
  }
  func.func @transform_0(%arg0: i32) -> (i32, i32, i32) {
    %c0_i32 = arith.constant 0 : i32
    %c0_i32_0 = arith.constant 0 : i32
    %c0_i32_1 = arith.constant 0 : i32
    return %arg0, %c0_i32, %c0_i32_0 : i32, i32, i32
  }
  func.func @transform_1(%arg0: i32) -> (i32, i32) {
    %c0_i32 = arith.constant 0 : i32
    %c0_i32_0 = arith.constant 0 : i32
    %c0_i32_1 = arith.constant 0 : i32
    return %c0_i32, %c0_i32_0 : i32, i32
  }
  func.func @transform_2(%arg0: i32) -> (i32, i32, i32) {
    %c0_i32 = arith.constant 0 : i32
    %c0_i32_0 = arith.constant 0 : i32
    %c0_i32_1 = arith.constant 0 : i32
    return %arg0, %c0_i32, %c0_i32_0 : i32, i32, i32
  }
}

</mosaic_0001>

<bundles_post_ra>
// kernel: conv2d_3x3_pallas.1
= control target key start
LH: loop header
LB: loop body
LE: loop exit
PB: predicated region body
PF: predicated region fallthrough
CT: control target
= control target key end

     0   :  { %s392_s9 = smov 0   ;;  %s453_s0 = inlined_call_operand.vmem [shape: f32[2,128,256], index: 0, kind: input, shape index: {}]   ;;  %s454_s1 = inlined_call_operand.vmem [shape: f32[12,128], index: 1, kind: input, shape index: {}]   ;;  %s455_s2 = inlined_call_operand.vmem [shape: f32[2,12,256], index: 2, kind: output, shape index: {}]  }
   0x1 LB: > { %s314_s10 = sadd.s32 4294967295, %s374_s9   ;;  %p318_p0 = scmp.ge.s32.totalorder %s374_s9, 1  ;;  %s374_s9 = sphi %s392_s9, %s12_s9  }
   0x2   : > { %p112_p1 = scmp.lt.s32.totalorder %s374_s9, 3 }
   0x4   : > { %p113_p2 = pnand %p318_p0, %p112_p1 }
   0x5   : > { %p134_p3 = scmp.lt.s32.totalorder (!%p113_p2), %s314_s10, 1 }
   0x6   : > { %116 = sbr.rel (%p113_p2) target bundleno = 243 (0xf3), region = 28 }
   0xb   : > { %v376_v0 = vmov 0.0   ;;  %s457_s10 = smov (!%p134_p3, %s314_s10), 1  ;;  %v144_v33 = vld [vmem:[%s454_s1] sm:$0xff]  ;;  %v145_v34 = vld [vmem:[%s454_s1 + $0x8] sm:$0xf] }
   0xc   : > { %242 = vmatprep.mubr.f32.mxu0 %v376_v0  ;;  %248 = vmatprep.mubr.f32.mxu1 %v376_v0  ;;  %s325_s11 = sshll.u32 %s457_s10, 8  ;;  %s326_s19 = sshll.u32 %s457_s10, 5 }
   0xd   : > { %s406_s14 = scalar_lea.vmem %s453_s0, %s325_s11  ;;  %s143_s22 = scalar_lea.vmem %s455_s2, %s326_s19 }
   0xe   : > { %v177_v1 = vld [vmem:[%s406_s14 + $0xf8] sm:$0xff]  ;;  %v176_v2 = vld [vmem:[%s406_s14 + $0xf0] sm:$0xff]  ;;  %v175_v3 = vld [vmem:[%s406_s14 + $0xe8] sm:$0xff] }
   0xf   : > { %178 = vmatprep.subr.mxu0 %v177_v1  ;;  %327 = vmatprep.subr.mxu1 %v177_v1  ;;  %v174_v4 = vld [vmem:[%s406_s14 + $0xe0] sm:$0xff]  ;;  %v173_v5 = vld [vmem:[%s406_s14 + $0xd8] sm:$0xff]  ;;  %v172_v6 = vld [vmem:[%s406_s14 + $0xd0] sm:$0xff] }
  0x10   : > { %179 = vmatpush1.msra.mxu0 %v176_v2  ;;  %343 = vmatpush1.msra.mxu1 %v176_v2  ;;  %v171_v7 = vld [vmem:[%s406_s14 + $0xc8] sm:$0xff]  ;;  %v170_v8 = vld [vmem:[%s406_s14 + $0xc0] sm:$0xff]  ;;  %v169_v9 = vld [vmem:[%s406_s14 + $0xb8] sm:$0xff] }
  0x11   : > { %180 = vmatprep.subr.mxu0 %v175_v3  ;;  %328 = vmatprep.subr.mxu1 %v175_v3  ;;  %v168_v10 = vld [vmem:[%s406_s14 + $0xb0] sm:$0xff]  ;;  %v167_v11 = vld [vmem:[%s406_s14 + $0xa8] sm:$0xff]  ;;  %v166_v12 = vld [vmem:[%s406_s14 + $0xa0] sm:$0xff] }
  0x12   : > { %181 = vmatpush1.msra.mxu0 %v174_v4  ;;  %344 = vmatpush1.msra.mxu1 %v174_v4  ;;  %v165_v13 = vld [vmem:[%s406_s14 + $0x98] sm:$0xff]  ;;  %v164_v14 = vld [vmem:[%s406_s14 + $0x90] sm:$0xff]  ;;  %v163_v15 = vld [vmem:[%s406_s14 + $0x88] sm:$0xff] }
  0x13   : > { %182 = vmatprep.subr.mxu0 %v173_v5  ;;  %329 = vmatprep.subr.mxu1 %v173_v5  ;;  %v162_v16 = vld [vmem:[%s406_s14 + $0x80] sm:$0xff]  ;;  %v161_v17 = vld [vmem:[%s406_s14 + $0x78] sm:$0xff]  ;;  %v160_v18 = vld [vmem:[%s406_s14 + $0x70] sm:$0xff] }
  0x14   : > { %183 = vmatpush1.msra.mxu0 %v172_v6  ;;  %345 = vmatpush1.msra.mxu1 %v172_v6  ;;  %v159_v19 = vld [vmem:[%s406_s14 + $0x68] sm:$0xff]  ;;  %v158_v20 = vld [vmem:[%s406_s14 + $0x60] sm:$0xff]  ;;  %v157_v21 = vld [vmem:[%s406_s14 + $0x58] sm:$0xff] }
  0x15   : > { %184 = vmatprep.subr.mxu0 %v171_v7  ;;  %330 = vmatprep.subr.mxu1 %v171_v7  ;;  %v156_v22 = vld [vmem:[%s406_s14 + $0x50] sm:$0xff]  ;;  %v155_v23 = vld [vmem:[%s406_s14 + $0x48] sm:$0xff]  ;;  %v154_v24 = vld [vmem:[%s406_s14 + $0x40] sm:$0xff] }
  0x16   : > { %185 = vmatpush1.msra.mxu0 %v170_v8  ;;  %346 = vmatpush1.msra.mxu1 %v170_v8  ;;  %v153_v25 = vld [vmem:[%s406_s14 + $0x38] sm:$0xff]  ;;  %v152_v26 = vld [vmem:[%s406_s14 + $0x30] sm:$0xff]  ;;  %v151_v27 = vld [vmem:[%s406_s14 + $0x28] sm:$0xff] }
  0x17   : > { %186 = vmatprep.subr.mxu0 %v169_v9  ;;  %331 = vmatprep.subr.mxu1 %v169_v9  ;;  %v150_v28 = vld [vmem:[%s406_s14 + $0x20] sm:$0xff]  ;;  %v149_v29 = vld [vmem:[%s406_s14 + $0x18] sm:$0xff]  ;;  %v148_v30 = vld [vmem:[%s406_s14 + $0x10] sm:$0xff] }
  0x18   : > { %187 = vmatpush1.msra.mxu0 %v168_v10  ;;  %347 = vmatpush1.msra.mxu1 %v168_v10  ;;  %v147_v31 = vld [vmem:[%s406_s14 + $0x8] sm:$0xff]  ;;  %v146_v32 = vld [vmem:[%s406_s14] sm:$0xff] }
  0x19   : > { %188 = vmatprep.subr.mxu0 %v167_v11  ;;  %332 = vmatprep.subr.mxu1 %v167_v11 }
  0x1a   : > { %189 = vmatpush1.msra.mxu0 %v166_v12  ;;  %348 = vmatpush1.msra.mxu1 %v166_v12 }
  0x1b   : > { %190 = vmatprep.subr.mxu0 %v165_v13  ;;  %333 = vmatprep.subr.mxu1 %v165_v13 }
  0x1c   : > { %191 = vmatpush1.msra.mxu0 %v164_v14  ;;  %349 = vmatpush1.msra.mxu1 %v164_v14 }
  0x1d   : > { %192 = vmatprep.subr.mxu0 %v163_v15  ;;  %334 = vmatprep.subr.mxu1 %v163_v15 }
  0x1e   : > { %193 = vmatpush1.msra.mxu0 %v162_v16  ;;  %350 = vmatpush1.msra.mxu1 %v162_v16 }
  0x1f   : > { %194 = vmatprep.subr.mxu0 %v161_v17  ;;  %335 = vmatprep.subr.mxu1 %v161_v17 }
  0x20   : > { %195 = vmatpush1.msra.mxu0 %v160_v18  ;;  %351 = vmatpush1.msra.mxu1 %v160_v18 }
  0x21   : > { %196 = vmatprep.subr.mxu0 %v159_v19  ;;  %336 = vmatprep.subr.mxu1 %v159_v19 }
  0x22   : > { %197 = vmatpush1.msra.mxu0 %v158_v20  ;;  %352 = vmatpush1.msra.mxu1 %v158_v20 }
  0x23   : > { %198 = vmatprep.subr.mxu0 %v157_v21  ;;  %337 = vmatprep.subr.mxu1 %v157_v21 }
  0x24   : > { %199 = vmatpush1.msra.mxu0 %v156_v22  ;;  %353 = vmatpush1.msra.mxu1 %v156_v22 }
  0x25   : > { %200 = vmatprep.subr.mxu0 %v155_v23  ;;  %338 = vmatprep.subr.mxu1 %v155_v23 }
  0x26   : > { %201 = vmatpush1.msra.mxu0 %v154_v24  ;;  %354 = vmatpush1.msra.mxu1 %v154_v24 }
  0x27   : > { %202 = vmatprep.subr.mxu0 %v153_v25  ;;  %339 = vmatprep.subr.mxu1 %v153_v25 }
  0x28   : > { %203 = vmatpush1.msra.mxu0 %v152_v26  ;;  %355 = vmatpush1.msra.mxu1 %v152_v26 }
  0x29   : > { %204 = vmatprep.subr.mxu0 %v151_v27  ;;  %340 = vmatprep.subr.mxu1 %v151_v27 }
  0x2a   : > { %205 = vmatpush1.msra.mxu0 %v150_v28  ;;  %356 = vmatpush1.msra.mxu1 %v150_v28 }
  0x2b   : > { %206 = vmatprep.subr.mxu0 %v149_v29  ;;  %341 = vmatprep.subr.mxu1 %v149_v29 }
  0x2c   : > { %207 = vmatpush1.msra.mxu0 %v148_v30  ;;  %357 = vmatpush1.msra.mxu1 %v148_v30 }
  0x2d   : > { %208 = vmatprep.subr.mxu0 %v147_v31  ;;  %342 = vmatprep.subr.mxu1 %v147_v31 }
  0x2e   : > { %209 = vmatpush1.msra.mxu0 %v146_v32  ;;  %358 = vmatpush1.msra.mxu1 %v146_v32 }
  0x2f   : > { %243 = vmatmul.mubr.f32.vlgmr.msra.gmra.mxu0 %v144_v33  ;;  %249 = vmatmul.mubr.f32.vlgmr.msra.gmra.mxu1 %v145_v34 }
  0xef   : > { %v244_v35 = vpop.f32.mrf.mxu0  ;;  %v250_v36 = vpop.f32.mrf.mxu1 }
  0xf0   : > { %255 = vst [vmem:[%s143_s22] sm:$0xff] %v244_v35  ;;  %257 = vst [vmem:[%s143_s22 + $0x10] sm:$0xf] %v250_v36 }
  0xf1   : > { %v246_v37 = vpop.f32.mrf.mxu0  ;;  %v252_v38 = vpop.f32.mrf.mxu1 }
  0xf2   : > { %256 = vst [vmem:[%s143_s22 + $0x8] sm:$0xff] %v246_v37  ;;  %258 = vst [vmem:[%s143_s22 + $0x18] sm:$0xf] %v252_v38 }
  0xf3 PF: > { %s12_s9 = sadd.s32 1, %s374_s9  }
  0xf4   : > { %p9_p4 = scmp.ge.s32.totalorder %s12_s9, 4  }
  0xf6   :  { %11 = sbr.rel (!%p9_p4) target bundleno = 1 (0x1), region = 58 }

</bundles_post_ra>
